<compile_context>
chip_gen: v6e
topology: v6e:2x2x1
jax: 0.10.0
libtpu: 0.0.40
codegen_flags: <defaults>
</compile_context>

<pallas_src>
import jax
import jax.numpy as jnp
from jax import lax
from jax.experimental import pallas as pl
from jax.experimental.pallas import tpu as pltpu


def _round_up(x, m):
    return ((x + m - 1) // m) * m


def _sublane_multiple(dtype):
    # Packed native tile heights: f32 -> 8, bf16 -> 16, int8/fp8 -> 32.
    return max(8, 32 // jnp.dtype(dtype).itemsize)


def _vmem_budget_bytes():
    # v5e/v6e: 128 MiB VMEM -> 96 MiB limit; v7x: 64 MiB per TC -> 48 MiB limit.
    try:
        cap = pltpu.get_tpu_info().vmem_capacity_bytes
    except Exception:
        cap = 128 * 1024 * 1024
    return min(96 * 1024 * 1024, int(cap) * 3 // 4)


def _linear_kernel_f32(x_ref, w_ref, b_ref, o_ref):
    # Grid: (i batch tiles, j out-feature tiles, k reduction tiles), k last.
    # o_ref (f32) doubles as the accumulator: its index_map ignores k, so the
    # block stays resident in VMEM across the whole reduction.
    @pl.when(pl.program_id(2) == 0)
    def _():
        o_ref[...] = jnp.broadcast_to(b_ref[...], o_ref.shape)

    # Transpose-free contraction: X (tm, tk) . W (tn, tk) over their last dims.
    o_ref[...] += lax.dot_general(
        x_ref[...], w_ref[...],
        dimension_numbers=(((1,), (1,)), ((), ())),
        preferred_element_type=jnp.float32,
    )


def _linear_kernel_acc(x_ref, w_ref, b_ref, o_ref, acc_ref):
    # Same as above but with an explicit f32 accumulator for non-f32 outputs.
    @pl.when(pl.program_id(2) == 0)
    def _():
        acc_ref[...] = jnp.broadcast_to(b_ref[...], acc_ref.shape)

    acc_ref[...] += lax.dot_general(
        x_ref[...], w_ref[...],
        dimension_numbers=(((1,), (1,)), ((), ())),
        preferred_element_type=jnp.float32,
    )

    @pl.when(pl.program_id(2) == pl.num_programs(2) - 1)
    def _():
        o_ref[...] = acc_ref[...].astype(o_ref.dtype)


def linear_forward(x, w, b, *, tm=512, tn=512, tk=1024, allow_fast_path=True):
    """Pallas equivalent of LinearRegression.forward(X) == nn.Linear(In, Out)(X)."""
    B, In = x.shape
    Out, In_w = w.shape
    assert In == In_w
    out_dtype = x.dtype

    # Tiny problems: pallas_call launch + per-step overhead dwarfs the compute.
    if allow_fast_path and (B * In * Out) < (128 * 128 * 128):
        y = jnp.dot(x, w.T, preferred_element_type=jnp.float32) + b.astype(jnp.float32)
        return y.astype(out_dtype)

    b2 = jnp.asarray(b, dtype=jnp.float32).reshape(1, Out)

    # dtype-aware sublane rounding; lane dims must be multiples of 128.
    sub_x = max(_sublane_multiple(x.dtype), _sublane_multiple(out_dtype))
    sub_w = _sublane_multiple(w.dtype)

    # Clamp tiles to the (padded) problem; keep tn >= 256-wide when Out allows so
    # v6e/v7x 256x256 MXU passes stay full.
    lane_n = 256 if Out >= 256 else 128
    tm = min(tm, _round_up(B, sub_x))
    tn = min(tn, _round_up(Out, max(lane_n, sub_w)))
    tk = min(tk, _round_up(In, 128))

    use_acc = out_dtype != jnp.float32
    vmem_limit = _vmem_budget_bytes()

    def _footprint(tm_, tn_, tk_):
        bx = jnp.dtype(x.dtype).itemsize
        bw = jnp.dtype(w.dtype).itemsize
        bo = jnp.dtype(out_dtype).itemsize
        dbl = 2 * (tm_ * tk_ * bx + tn_ * tk_ * bw + tn_ * 4 + tm_ * tn_ * bo)
        return dbl + (tm_ * tn_ * 4 if use_acc else 0)

    # Shrink tiles if the double-buffered footprint would exceed the per-chip
    # budget (matters on v7x's 64 MiB-per-TC VMEM).
    while _footprint(tm, tn, tk) > (vmem_limit * 6) // 10:
        if tk > 512:
            tk //= 2
        elif tn > 256:
            tn //= 2
        elif tm > 256:
            tm //= 2
        else:
            break

    Bp, Inp, Outp = _round_up(B, tm), _round_up(In, tk), _round_up(Out, tn)

    # Pad only when needed (shapes are static, so these ifs are free under jit).
    # Zero-padding K contributes nothing to the dot; padded rows/cols are sliced off.
    x_p = x if (Bp == B and Inp == In) else jnp.pad(x, ((0, Bp - B), (0, Inp - In)))
    w_p = w if (Outp == Out and Inp == In) else jnp.pad(w, ((0, Outp - Out), (0, Inp - In)))
    b_p = b2 if Outp == Out else jnp.pad(b2, ((0, 0), (0, Outp - Out)))

    grid = (Bp // tm, Outp // tn, Inp // tk)  # reduction (k) axis last

    kernel = _linear_kernel_acc if use_acc else _linear_kernel_f32
    scratch = [pltpu.VMEM((tm, tn), jnp.float32)] if use_acc else []

    y_p = pl.pallas_call(
        kernel,
        out_shape=jax.ShapeDtypeStruct((Bp, Outp), out_dtype),
        grid=grid,
        in_specs=[
            pl.BlockSpec((tm, tk), lambda i, j, k: (i, k)),   # X tile
            pl.BlockSpec((tn, tk), lambda i, j, k: (j, k)),   # W tile, (Out, In) layout
            pl.BlockSpec((1, tn), lambda i, j, k: (0, j)),    # bias tile
        ],
        out_specs=pl.BlockSpec((tm, tn), lambda i, j, k: (i, j)),
        scratch_shapes=scratch,
        compiler_params=pltpu.CompilerParams(
            dimension_semantics=("parallel", "parallel", "arbitrary"),
            vmem_limit_bytes=vmem_limit,
        ),
    )(x_p, w_p, b_p)

    if Bp == B and Outp == Out:
        return y_p
    return y_p[:B, :Out]


if __name__ == "__main__":
    key = jax.random.PRNGKey(0)
    kx, kw, kb, kx2, kw2, kb2 = jax.random.split(key, 6)

    # 1) Lab shapes: inputSize = len(w) = 2, outputSize = 1.
    inputSize, outputSize, batch = 2, 1, 8
    X = jax.random.normal(kx, (batch, inputSize), dtype=jnp.float32)
    W = jax.random.normal(kw, (outputSize, inputSize), dtype=jnp.float32) * 0.1
    Bias = jax.random.normal(kb, (outputSize,), dtype=jnp.float32) * 0.1

    y_fast = linear_forward(X, W, Bias)                          # tiny -> plain-JAX fast path
    y_tiny = linear_forward(X, W, Bias, allow_fast_path=False)   # forces the Pallas kernel
    jax.block_until_ready((y_fast, y_tiny))
    y_ref = X @ W.T + Bias
    assert y_fast.shape == (batch, outputSize)
    assert y_tiny.shape == (batch, outputSize)
    assert jnp.allclose(y_fast, y_ref, atol=1e-5, rtol=1e-5)
    assert jnp.allclose(y_tiny, y_ref, atol=1e-5, rtol=1e-5)

    # 2) A modest non-aligned shape that exercises the tiled Pallas path
    #    (padding on every axis + a multi-step k reduction).
    B2, In2, Out2 = 256, 1280, 384
    X2 = jax.random.normal(kx2, (B2, In2), dtype=jnp.float32)
    W2 = jax.random.normal(kw2, (Out2, In2), dtype=jnp.float32) * 0.05
    Bias2 = jax.random.normal(kb2, (Out2,), dtype=jnp.float32) * 0.1

    y2 = linear_forward(X2, W2, Bias2)
    jax.block_until_ready(y2)
    y2_ref = jnp.dot(X2, W2.T, precision=lax.Precision.HIGHEST) + Bias2
    assert y2.shape == (B2, Out2)
    assert jnp.allclose(y2, y2_ref, atol=1e-3, rtol=1e-3)

    # TODO(synk): loss() (MSELoss) and configure_optimizers() (SGD) are training
    # utilities, not part of the forward pass, and are not implemented as kernels.

    print("KERNEL_OK")
</pallas_src>

<mosaic_0001>
module attributes {stable_mosaic.version = 11 : i64} {
  func.func @_linear_kernel_f32(%arg0: i32, %arg1: i32, %arg2: i32, %arg3: memref<8x128xf32, #tpu.memory_space<vmem>>, %arg4: memref<128x128xf32, #tpu.memory_space<vmem>>, %arg5: memref<1x128xf32, #tpu.memory_space<vmem>>, %arg6: memref<8x128xf32, #tpu.memory_space<vmem>>) attributes {dimension_semantics = [#tpu.dimension_semantics<parallel>, #tpu.dimension_semantics<parallel>, #tpu.dimension_semantics<arbitrary>], iteration_bounds = array<i64: 1, 1, 1>, scalar_prefetch = 0 : i64, scratch_operands = 0 : i64, tpu.core_type = #tpu.core_type<tc>, window_params = [{transform_indices = @transform_0, window_bounds = array<i64: 8, 128>}, {transform_indices = @transform_1, window_bounds = array<i64: 128, 128>}, {transform_indices = @transform_2, window_bounds = array<i64: 1, 128>}, {transform_indices = @transform_3, window_bounds = array<i64: 8, 128>}]} {
    %c0_i32 = arith.constant 0 : i32
    %0 = arith.cmpi eq, %arg2, %c0_i32 : i32
    %1 = arith.extui %0 : i1 to i32
    %c0_i32_0 = arith.constant 0 : i32
    %2 = arith.cmpi ne, %1, %c0_i32_0 : i32
    scf.if %2 {
      %c0_8 = arith.constant 0 : index
      %c0_9 = arith.constant 0 : index
      %9 = vector.load %arg5[%c0_8, %c0_9] : memref<1x128xf32, #tpu.memory_space<vmem>>, vector<1x128xf32>
      %10 = vector.shape_cast %9 : vector<1x128xf32> to vector<1x128xf32>
      %11 = vector.broadcast %10 : vector<1x128xf32> to vector<8x128xf32>
      %c0_10 = arith.constant 0 : index
      %c0_11 = arith.constant 0 : index
      %12 = vector.load %arg6[%c0_10, %c0_11] : memref<8x128xf32, #tpu.memory_space<vmem>>, vector<8x128xf32>
      tpu.vector_store %arg6[%c0_10, %c0_11], %11 {strides = array<i32>} : memref<8x128xf32, #tpu.memory_space<vmem>>, vector<8x128xf32>,
    } else {
    }
    %c0 = arith.constant 0 : index
    %c0_1 = arith.constant 0 : index
    %3 = vector.load %arg6[%c0, %c0_1] : memref<8x128xf32, #tpu.memory_space<vmem>>, vector<8x128xf32>
    %c0_2 = arith.constant 0 : index
    %c0_3 = arith.constant 0 : index
    %4 = vector.load %arg3[%c0_2, %c0_3] : memref<8x128xf32, #tpu.memory_space<vmem>>, vector<8x128xf32>
    %c0_4 = arith.constant 0 : index
    %c0_5 = arith.constant 0 : index
    %5 = vector.load %arg4[%c0_4, %c0_5] : memref<128x128xf32, #tpu.memory_space<vmem>>, vector<128x128xf32>
    %cst = arith.constant dense<0.000000e+00> : vector<8x128xf32>
    %6 = tpu.matmul %4, %5, %cst {dimension_numbers = #tpu.dot_dimension_numbers<[1], [1], [0], [0], [0, 0, 1, 0], [], []>} : vector<8x128xf32>, vector<128x128xf32>, vector<8x128xf32> -> vector<8x128xf32>
    %7 = arith.addf %3, %6 : vector<8x128xf32>
    %c0_6 = arith.constant 0 : index
    %c0_7 = arith.constant 0 : index
    %8 = vector.load %arg6[%c0_6, %c0_7] : memref<8x128xf32, #tpu.memory_space<vmem>>, vector<8x128xf32>
    tpu.vector_store %arg6[%c0_6, %c0_7], %7 {strides = array<i32>} : memref<8x128xf32, #tpu.memory_space<vmem>>, vector<8x128xf32>,
    return
  }
  func.func @transform_0(%arg0: i32, %arg1: i32, %arg2: i32) -> (i32, i32) {
    %c0_i32 = arith.constant 0 : i32
    return %arg0, %arg2 : i32, i32
  }
  func.func @transform_1(%arg0: i32, %arg1: i32, %arg2: i32) -> (i32, i32) {
    %c0_i32 = arith.constant 0 : i32
    return %arg1, %arg2 : i32, i32
  }
  func.func @transform_2(%arg0: i32, %arg1: i32, %arg2: i32) -> (i32, i32) {
    %c0_i32 = arith.constant 0 : i32
    %c0_i32_0 = arith.constant 0 : i32
    return %c0_i32, %arg1 : i32, i32
  }
  func.func @transform_3(%arg0: i32, %arg1: i32, %arg2: i32) -> (i32, i32) {
    %c0_i32 = arith.constant 0 : i32
    return %arg0, %arg1 : i32, i32
  }
}

</mosaic_0001>

<bundles_post_ra>
// kernel: tpu_custom_call.1
= control target key start
LH: loop header
LB: loop body
LE: loop exit
PB: predicated region body
PF: predicated region fallthrough
CT: control target
= control target key end

     0   :  { %8 = vsyncpa [#allocation3], 0  ;;  %s324_s0 = inlined_call_operand.hbm [shape: f32[8,128], index: 0, kind: input, shape index: {}]   ;;  %s325_s1 = inlined_call_operand.hbm [shape: f32[128,128], index: 1, kind: input, shape index: {}]   ;;  %s326_s2 = inlined_call_operand.vmem [shape: f32[1,128], index: 2, kind: input, shape index: {}]   ;;  %s327_s3 = inlined_call_operand.hbm [shape: f32[8,128], index: 3, kind: output, shape index: {}]  }
   0x1   :  { %9 = vsyncpa [#allocation6], 0 }
   0x2   :  { %10 = vsyncpa [#allocation4], 0  ;;  %s285_s12 = smov [#allocation2]   ;;  %s286_s14 = smov [#allocation5]  }
   0x3   :  { %s17_s13 = sshll.u32 %s285_s12, 4  ;;  %s26_s15 = sshll.u32 %s286_s14, 4  ;;  %s18_s13 = int_to_ptr.vmem [resolvable:$true] %s17_s13  ;;  %s27_s15 = int_to_ptr.vmem [resolvable:$true] %s26_s15 }
   0x4   :  { %s227_s16 = scalar_lea.vmem %s18_s13, 128  ;;  %p232_p1 = scmp.lt.s32.totalorder %s18_s13, %s18_s13 }
   0x5   :  { %p228_p0 = scmp.ne.s32.totalorder %s18_s13, %s227_s16  ;;  %p233_p2 = scmp.lt.s32.totalorder %s227_s16, %s227_s16 }
   0x7   :  { %p234_p3 = por %p233_p2, %p232_p1 }
   0x9   :  { %p235_p4 = pnand %p234_p3, %p228_p0 }
   0xb   :  { %238 = shalt.err (!%p235_p4)
}
   0xc   :  { %20 = dma.hbm_to_vmem [thread:$0]  %s324_s0, 128, %s18_s13, [#allocation3]  }
   0xd   :  { %s247_s19 = scalar_lea.vmem %s27_s15, 2048  ;;  %p252_p6 = scmp.lt.s32.totalorder %s27_s15, %s27_s15 }
   0xe   :  { %p248_p5 = scmp.ne.s32.totalorder %s27_s15, %s247_s19  ;;  %p253_p7 = scmp.lt.s32.totalorder %s247_s19, %s247_s19 }
  0x10   :  { %p254_p8 = por %p253_p7, %p252_p6 }
  0x12   :  { %p255_p9 = pnand %p254_p8, %p248_p5 }
  0x14   :  { %258 = shalt.err (!%p255_p9)
}
  0x15   :  { %s287_s20 = smov 128   ;;  %s288_s21 = smov 8  }
  0x16   :  { %32 = dma.hbm_to_vmem [thread:$0]  %s325_s1, 2048, %s27_s15, [#allocation6], %s287_s20, %s287_s20, %s288_s21  }
  0x17   :  { %279 = dma.done.wait [#allocation3], 128  }
  0x18   :  { %280 = vsyncadd [#allocation3], 4294967168 }
  0x19   :  { %281 = dma.done.wait [#allocation6], 2048  }
  0x1a   :  { %282 = vsyncadd [#allocation6], 4294965248  ;;  %v289_v0 = vmov 0.0   ;;  %vm290_vm0 = vmmov 0   ;;  %v70_v1 = vld [vmem:[#allocation5 + $0x78] sm:$0xff]  ;;  %v69_v2 = vld [vmem:[#allocation5 + $0x70] sm:$0xff] }
  0x1b   :  { %177 = vmatprep.subr.mxu0 %v289_v0  ;;  %209 = vmatprep.mubr.msk.f32.mxu0 %vm290_vm0, %v289_v0  ;;  %v68_v3 = vld [vmem:[#allocation5 + $0x68] sm:$0xff]  ;;  %v67_v4 = vld [vmem:[#allocation5 + $0x60] sm:$0xff]  ;;  %v66_v5 = vld [vmem:[#allocation5 + $0x58] sm:$0xff]  ;;  %s291_s24 = smov [#allocation7]  }
  0x1c   :  { %178 = vmatpush3.xpose.msra.mxu0 %v70_v1  ;;  %v65_v6 = vld [vmem:[#allocation5 + $0x50] sm:$0xff]  ;;  %v64_v7 = vld [vmem:[#allocation5 + $0x48] sm:$0xff]  ;;  %v63_v8 = vld [vmem:[#allocation5 + $0x40] sm:$0xff]  ;;  %s149_s25 = sshll.u32 %s291_s24, 4  ;;  %s150_s25 = int_to_ptr.vmem [resolvable:$true] %s149_s25 }
  0x1d   :  { %179 = vmatprep.subr.mxu0 %v289_v0  ;;  %v62_v9 = vld [vmem:[#allocation5 + $0x38] sm:$0xff]  ;;  %v61_v10 = vld [vmem:[#allocation5 + $0x30] sm:$0xff]  ;;  %v60_v11 = vld [vmem:[#allocation5 + $0x28] sm:$0xff]  ;;  %s259_s26 = scalar_lea.vmem %s150_s25, 128  ;;  %p264_p11 = scmp.lt.s32.totalorder %s150_s25, %s150_s25 }
  0x1e   :  { %v59_v12 = vld [vmem:[#allocation5 + $0x20] sm:$0xff]  ;;  %v58_v13 = vld [vmem:[#allocation5 + $0x18] sm:$0xff]  ;;  %v57_v14 = vld [vmem:[#allocation5 + $0x10] sm:$0xff]  ;;  %p260_p10 = scmp.ne.s32.totalorder %s150_s25, %s259_s26  ;;  %p265_p12 = scmp.lt.s32.totalorder %s259_s26, %s259_s26 }
  0x1f   :  { %v56_v15 = vld [vmem:[#allocation5 + $0x8] sm:$0xff]  ;;  %v55_v16 = vld [vmem:[#allocation5] sm:$0xff]  ;;  %v54_v17 = vld [vmem:[#allocation2] sm:$0xff] }
  0x20   :  { %180 = vmatpush3.xpose.msra.mxu0 %v69_v2  ;;  %v159_v18 = vld [vmem:[%s326_s2] ss:$0 sm:$0xff]  ;;  %p266_p13 = por %p265_p12, %p264_p11 }
  0x21   :  { %181 = vmatprep.subr.mxu0 %v289_v0 }
  0x22   :  { %p267_p0 = pnand %p266_p13, %p260_p10 }
  0x24   :  { %182 = vmatpush3.xpose.msra.mxu0 %v68_v3 }
  0x25   :  { %183 = vmatprep.subr.mxu0 %v289_v0 }
  0x28   :  { %184 = vmatpush3.xpose.msra.mxu0 %v67_v4 }
  0x29   :  { %185 = vmatprep.subr.mxu0 %v289_v0 }
  0x2c   :  { %186 = vmatpush3.xpose.msra.mxu0 %v66_v5 }
  0x2d   :  { %187 = vmatprep.subr.mxu0 %v289_v0 }
  0x30   :  { %188 = vmatpush3.xpose.msra.mxu0 %v65_v6 }
  0x31   :  { %189 = vmatprep.subr.mxu0 %v289_v0 }
  0x34   :  { %190 = vmatpush3.xpose.msra.mxu0 %v64_v7 }
  0x35   :  { %191 = vmatprep.subr.mxu0 %v289_v0 }
  0x38   :  { %192 = vmatpush3.xpose.msra.mxu0 %v63_v8 }
  0x39   :  { %193 = vmatprep.subr.mxu0 %v289_v0 }
  0x3c   :  { %194 = vmatpush3.xpose.msra.mxu0 %v62_v9 }
  0x3d   :  { %195 = vmatprep.subr.mxu0 %v289_v0 }
  0x40   :  { %196 = vmatpush3.xpose.msra.mxu0 %v61_v10 }
  0x41   :  { %197 = vmatprep.subr.mxu0 %v289_v0 }
  0x44   :  { %198 = vmatpush3.xpose.msra.mxu0 %v60_v11 }
  0x45   :  { %199 = vmatprep.subr.mxu0 %v289_v0 }
  0x48   :  { %200 = vmatpush3.xpose.msra.mxu0 %v59_v12 }
  0x49   :  { %201 = vmatprep.subr.mxu0 %v289_v0 }
  0x4c   :  { %202 = vmatpush3.xpose.msra.mxu0 %v58_v13 }
  0x4d   :  { %203 = vmatprep.subr.mxu0 %v289_v0 }
  0x50   :  { %204 = vmatpush3.xpose.msra.mxu0 %v57_v14 }
  0x51   :  { %205 = vmatprep.subr.mxu0 %v289_v0 }
  0x54   :  { %206 = vmatpush3.xpose.msra.mxu0 %v56_v15 }
  0x55   :  { %207 = vmatprep.subr.mxu0 %v289_v0 }
  0x58   :  { %208 = vmatpush3.xpose.msra.mxu0 %v55_v16 }
  0x5b   :  { %210 = vmatmul.mubr.f32.vlgmr.msra.gmra.mxu0 %v54_v17 }
 0x11b   :  { %v137_v19 = vpop.f32.mrf.mxu0 }
 0x11c   :  { %v141_v20 = vadd.f32 %v159_v18, %v137_v19 }
 0x11d   :  { %v211_v21 = vpop.f32.mrf.mxu0 }
 0x11e   :  { %142 = vst [vmem:[#allocation7] sm:$0xff] %v141_v20 }
 0x11f   :  { %270 = shalt.err (!%p267_p0)
}
 0x120   :  { %152 = dma.vmem_to_hbm [thread:$0]  %s150_s25, 128, %s327_s3, [#allocation4]  }
 0x121   :  { %283 = dma.done.wait [#allocation4], 128  }
 0x122   :  { %284 = vsyncadd [#allocation4], 4294967168 }
 0x123   :  { %156 = vsyncpa [#allocation3], 1 }
 0x124   :  { %157 = vsyncpa [#allocation6], 1 }
 0x125   :  { %158 = vsyncpa [#allocation4], 1 }

</bundles_post_ra>
